<compile_context>
chip_gen: v5e
topology: v5e:2x2
jax: 0.10.0
libtpu: 0.0.40
codegen_flags: <defaults>
</compile_context>

<pallas_src>
import functools

import jax
import jax.numpy as jnp
from jax.experimental import pallas as pl
from jax.experimental.pallas import tpu as pltpu


def fused_mlp_kernel(x_ref, w_ref, b_ref, o_ref):
    # One MXU matmul on the (tb, 8) x (8, C) tile plus a single broadcast
    # bias add; everything is VMEM-resident (weights/bias have a constant
    # index_map so they are fetched once and reused across batch tiles).
    acc = jnp.dot(x_ref[...], w_ref[...], preferred_element_type=jnp.float32)
    o_ref[...] = (acc + b_ref[...]).astype(o_ref.dtype)


def _round_up(n, m):
    return ((n + m - 1) // m) * m


def fuse_params(w1, b1, w2, b2):
    """Fold Linear∘Linear into one affine map. Done ONCE at init, not per call.

    w1: (8, 4)  b1: (1, 4)  w2: (4, C)  b2: (1, C)
    Returns w_fused: (8, C), b_fused: (1, C).
    Mathematically exact (FP rounding order differs from sequential fc2(fc1(x))
    at the ULP level only).
    """
    w_fused = (w1 @ w2).astype(jnp.float32)
    b_fused = (b1 @ w2 + b2).astype(jnp.float32)
    return w_fused, b_fused


@functools.partial(jax.jit, static_argnames=("tile_b",))
def net_forward(x, w_fused, b_fused, *, tile_b=2048):
    """Exact forward of fc2(fc1(x)) given pre-fused parameters.

    x: (B, 8)  w_fused: (8, C)  b_fused: (1, C)  ->  (B, C)
    """
    B, K = x.shape
    C = w_fused.shape[1]

    # Row tile: multiple of 8 (sublane rule). Large default amortizes the
    # ~0.35 us per-grid-step overhead; working set is tiny either way.
    tb = min(tile_b, _round_up(B, 8))
    if B > 8:
        # Keep >= 2 grid steps so dimension_semantics=("parallel",) can shard
        # the batch across v7x's two TensorCores (harmless on v5e/v6e).
        tb = min(tb, max(8, _round_up(pl.cdiv(B, 2), 8)))

    grid = (pl.cdiv(B, tb),)

    out = pl.pallas_call(
        fused_mlp_kernel,
        out_shape=jax.ShapeDtypeStruct((B, C), x.dtype),
        grid_spec=pltpu.PrefetchScalarGridSpec(
            num_scalar_prefetch=0,
            grid=grid,
            in_specs=[
                # Stream unpadded row tiles of x: last dim == full array dim
                # (8) satisfies the lane rule; tb is a multiple of 8.
                pl.BlockSpec((tb, K), lambda i: (i, 0)),
                # Fused weights / bias: constant index_map -> VMEM-resident,
                # fetched once and reused for every batch tile. Full-dim
                # blocks, no lane padding.
                pl.BlockSpec((K, C), lambda i: (0, 0)),
                pl.BlockSpec((1, C), lambda i: (0, 0)),
            ],
            # Unpadded output: full-dim last axis (C=10); Pallas masks the
            # partial last batch tile on writeback.
            out_specs=pl.BlockSpec((tb, C), lambda i: (i, 0)),
        ),
        compiler_params=pltpu.CompilerParams(
            dimension_semantics=("parallel",),
        ),
    )(x, w_fused, b_fused)

    return out


def init_params(key, num_class=10):
    # Deterministic synthetic init (PyTorch-Linear-style uniform bounds).
    k1, k2, k3, k4 = jax.random.split(key, 4)
    bound1 = 1.0 / jnp.sqrt(8.0)
    bound2 = 1.0 / jnp.sqrt(4.0)
    w1 = jax.random.uniform(k1, (8, 4), jnp.float32, -bound1, bound1)
    b1 = jax.random.uniform(k2, (1, 4), jnp.float32, -bound1, bound1)
    w2 = jax.random.uniform(k3, (4, num_class), jnp.float32, -bound2, bound2)
    b2 = jax.random.uniform(k4, (1, num_class), jnp.float32, -bound2, bound2)
    return w1, b1, w2, b2


if __name__ == "__main__":
    key = jax.random.PRNGKey(0)
    kx, kp, kb = jax.random.split(key, 3)

    w1, b1, w2, b2 = init_params(kp, num_class=10)
    # One-time parameter fusion (hoisted out of the per-call forward path).
    w_fused, b_fused = fuse_params(w1, b1, w2, b2)
    w_fused, b_fused = jax.block_until_ready((w_fused, b_fused))

    # Matches the module's usage: x = torch.randn((3, 8))
    x = jax.random.normal(kx, (3, 8), jnp.float32)
    out = net_forward(x, w_fused, b_fused)
    jax.block_until_ready(out)

    ref = (x @ w1 + b1) @ w2 + b2
    assert out.shape == (3, 10)
    assert jnp.allclose(out, ref, atol=1e-5, rtol=1e-5)

    # Also exercise the multi-step "parallel" grid path (non-aligned batch,
    # partial last tile, >=2 grid steps).
    xb = jax.random.normal(kb, (300, 8), jnp.float32)
    outb = net_forward(xb, w_fused, b_fused)
    jax.block_until_ready(outb)
    refb = (xb @ w1 + b1) @ w2 + b2
    assert outb.shape == (300, 10)
    assert jnp.allclose(outb, refb, atol=1e-5, rtol=1e-5)

    print("KERNEL_OK")
</pallas_src>

<mosaic_0001>
module attributes {stable_mosaic.version = 11 : i64} {
  func.func @fused_mlp_kernel(%arg0: i32, %arg1: memref<8x8xf32, #tpu.memory_space<vmem>>, %arg2: memref<8x10xf32, #tpu.memory_space<vmem>>, %arg3: memref<1x10xf32, #tpu.memory_space<vmem>>, %arg4: memref<8x10xf32, #tpu.memory_space<vmem>>) attributes {dimension_semantics = [#tpu.dimension_semantics<parallel>], iteration_bounds = array<i64: 1>, scalar_prefetch = 0 : i64, scratch_operands = 0 : i64, tpu.core_type = #tpu.core_type<tc>, window_params = [{transform_indices = @transform_0, window_bounds = array<i64: 8, 8>}, {pipeline_mode = #tpu.pipeline_mode<synchronous>, transform_indices = @transform_1, window_bounds = array<i64: 8, 10>}, {pipeline_mode = #tpu.pipeline_mode<synchronous>, transform_indices = @transform_2, window_bounds = array<i64: 1, 10>}, {transform_indices = @transform_3, window_bounds = array<i64: 8, 10>}]} {
    %c0 = arith.constant 0 : index
    %c0_0 = arith.constant 0 : index
    %0 = vector.load %arg1[%c0, %c0_0] : memref<8x8xf32, #tpu.memory_space<vmem>>, vector<8x8xf32>
    %c0_1 = arith.constant 0 : index
    %c0_2 = arith.constant 0 : index
    %1 = vector.load %arg2[%c0_1, %c0_2] : memref<8x10xf32, #tpu.memory_space<vmem>>, vector<8x10xf32>
    %cst = arith.constant dense<0.000000e+00> : vector<8x10xf32>
    %2 = tpu.matmul %0, %1, %cst {dimension_numbers = #tpu.dot_dimension_numbers<[1], [0], [0], [1], [0, 0, 1, 1], [], []>} : vector<8x8xf32>, vector<8x10xf32>, vector<8x10xf32> -> vector<8x10xf32>
    %c0_3 = arith.constant 0 : index
    %c0_4 = arith.constant 0 : index
    %3 = vector.load %arg3[%c0_3, %c0_4] : memref<1x10xf32, #tpu.memory_space<vmem>>, vector<1x10xf32>
    %4 = vector.broadcast %3 : vector<1x10xf32> to vector<8x10xf32>
    %5 = arith.addf %2, %4 : vector<8x10xf32>
    %c0_5 = arith.constant 0 : index
    %c0_6 = arith.constant 0 : index
    %6 = vector.load %arg4[%c0_5, %c0_6] : memref<8x10xf32, #tpu.memory_space<vmem>>, vector<8x10xf32>
    tpu.vector_store %arg4[%c0_5, %c0_6], %5 {strides = array<i32>} : memref<8x10xf32, #tpu.memory_space<vmem>>, vector<8x10xf32>,
    return
  }
  func.func @transform_0(%arg0: i32) -> (i32, i32) {
    %c0_i32 = arith.constant 0 : i32
    %c0_i32_0 = arith.constant 0 : i32
    return %arg0, %c0_i32 : i32, i32
  }
  func.func @transform_1(%arg0: i32) -> (i32, i32) {
    %c0_i32 = arith.constant 0 : i32
    %c0_i32_0 = arith.constant 0 : i32
    %c0_i32_1 = arith.constant 0 : i32
    return %c0_i32, %c0_i32_0 : i32, i32
  }
  func.func @transform_2(%arg0: i32) -> (i32, i32) {
    %c0_i32 = arith.constant 0 : i32
    %c0_i32_0 = arith.constant 0 : i32
    %c0_i32_1 = arith.constant 0 : i32
    return %c0_i32, %c0_i32_0 : i32, i32
  }
  func.func @transform_3(%arg0: i32) -> (i32, i32) {
    %c0_i32 = arith.constant 0 : i32
    %c0_i32_0 = arith.constant 0 : i32
    return %arg0, %c0_i32 : i32, i32
  }
}

</mosaic_0001>

<bundles_post_ra>
// kernel: net_forward.1
= control target key start
LH: loop header
LB: loop body
LE: loop exit
PB: predicated region body
PF: predicated region fallthrough
CT: control target
= control target key end

     0   :  { %8 = vsyncpa [#allocation3], 0  ;;  %s225_s0 = inlined_call_operand.hbm [shape: f32[3,8], index: 0, kind: input, shape index: {}]   ;;  %s226_s1 = inlined_call_operand.hbm [shape: f32[8,10], index: 1, kind: input, shape index: {}]   ;;  %s227_s2 = inlined_call_operand.vmem [shape: f32[1,10], index: 2, kind: input, shape index: {}]   ;;  %s228_s3 = inlined_call_operand.hbm [shape: f32[3,10], index: 3, kind: output, shape index: {}]  }
   0x1   :  { %9 = vsyncpa [#allocation6], 0 }
   0x2   :  { %10 = vsyncpa [#allocation4], 0 }
   0x3   :  { %14 = vsyncadd [#allocation3], 64  ;;  %s15_s14 = sshll.u32 %s225_s0, 4  ;;  %s182_s15 = smov [#allocation2]   ;;  %s16_s14 = int_to_ptr.hbm [resolvable:$true] %s15_s14 }
   0x4   :  { %s17_s16 = sshll.u32 %s182_s15, 4  ;;  %s29_s19 = sshll.u32 %s226_s1, 4  ;;  %s18_s16 = int_to_ptr.vmem [resolvable:$true] %s17_s16  ;;  %s30_s19 = int_to_ptr.hbm [resolvable:$true] %s29_s19 }
   0x5   :  { %s183_s20 = smov 64   ;;  %s184_s21 = smov 4  }
   0x6   :  { %23 = dma.hbm_to_vmem [thread:$0]  %s16_s14, 64, %s18_s16, [#allocation3], %s183_s20, %s183_s20, %s184_s21  }
   0x7   :  { %s185_s22 = smov [#allocation5]  }
   0x8   :  { %s31_s23 = sshll.u32 %s185_s22, 4  ;;  %s32_s23 = int_to_ptr.vmem [resolvable:$true] %s31_s23 }
   0x9   :  { %34 = dma.hbm_to_vmem [thread:$0]  %s30_s19, 128, %s32_s23, [#allocation6]  }
   0xa   :  { %176 = dma.done.wait [#allocation3], 128  }
   0xb   :  { %177 = vsyncadd [#allocation3], 4294967168 }
   0xc   :  { %178 = dma.done.wait [#allocation6], 128  }
   0xd   :  { %179 = vsyncadd [#allocation6], 4294967168  ;;  %vm51_vm0 = vcmask 64512   ;;  %v46_v0 = vld [vmem:[#allocation5] sm:$0xff]  ;;  %v45_v1 = vld [vmem:[#allocation2] sm:$0xff]  ;;  %vm75_vm1 = vcmask 80896  }
   0xe   :  { %70 = vmatpush.msra.mxu0 %v46_v0  ;;  %v103_v2 = vld [vmem:[%s227_s2] ss:$0 sm:$0xff] }
   0xf   :  { %97 = vmatmul.msk.f32.vlgmr.msra.gmra.mxu0 %vm51_vm0, %v45_v1 }
  0x8c   :  { %v72_v3 = vpop.f32.mrf.mxu0 }
  0x8d   :  { %v73_v4 = vadd.f32 %v103_v2, %v72_v3 }
  0x8f   :  { %76 = vst.msk [vmem:[#allocation7] sm:$0xff] %vm75_vm1, %v73_v4 }
  0x90   :  { %80 = vsyncadd [#allocation4], 64  ;;  %s83_s26 = sshll.u32 %s228_s3, 4  ;;  %s186_s27 = smov [#allocation7]   ;;  %s84_s26 = int_to_ptr.hbm [resolvable:$true] %s83_s26 }
  0x91   :  { %s81_s28 = sshll.u32 %s186_s27, 4  ;;  %s82_s28 = int_to_ptr.vmem [resolvable:$true] %s81_s28 }
  0x92   :  { %89 = dma.vmem_to_hbm [thread:$0]  %s82_s28, 64, %s84_s26, [#allocation4], %s183_s20, %s183_s20, %s184_s21  }
  0x93   :  { %180 = dma.done.wait [#allocation4], 128  }
  0x94   :  { %181 = vsyncadd [#allocation4], 4294967168 }
  0x95   :  { %94 = vsyncpa [#allocation3], 1 }
  0x96   :  { %95 = vsyncpa [#allocation6], 1 }
  0x97   :  { %96 = vsyncpa [#allocation4], 1 }

</bundles_post_ra>
